<compile_context>
chip_gen: v5e
topology: v5e:2x2
jax: 0.10.0
libtpu: 0.0.40
codegen_flags: <defaults>
</compile_context>

<pallas_src>
import jax
import jax.numpy as jnp
from jax.experimental import pallas as pl
from jax.experimental.pallas import tpu as pltpu


# ----------------------------------------------------------------------------
# Kernel
# ----------------------------------------------------------------------------
def _kg_fused_lm_kernel(gp_ref, wh_ref, h_ref, o_ref, fused_sc):
    # grid = (B, S_tiles, V_tiles); V is the innermost ("arbitrary") axis.
    # Build the fused bf16 hidden tile once per (b, s-tile); every V tile then
    # only runs the hot bf16 x bf16 MXU matmul with f32 accumulation.
    @pl.when(pl.program_id(2) == 0)
    def _():
        # fused_state = last_hidden_state + gate * kg_proj  (broadcast over S)
        fused_sc[...] = h_ref[0] + gp_ref[0]                       # (ts, H) bf16

    o_ref[0] = jnp.dot(fused_sc[...], wh_ref[...],
                       preferred_element_type=jnp.float32
                       ).astype(o_ref.dtype)                       # (ts, tv)


# ----------------------------------------------------------------------------
# Tile selection helpers
# ----------------------------------------------------------------------------
def _divisor_tiles(total, cap, align):
    """Divisors of `total` that are multiples of `align` (or == total), desc."""
    cap = min(cap, total)
    cands = {t for t in range(align, cap + 1, align) if total % t == 0}
    if total <= cap:
        cands.add(total)
    if not cands:
        cands.add(total)
    return sorted(cands, reverse=True)


def _vmem_capacity_bytes():
    try:
        cap = int(pltpu.get_tpu_info().vmem_capacity_bytes)
        if cap >= (16 << 20):
            return cap
    except Exception:
        pass
    return 64 << 20            # v7x-safe fallback (v5e/v6e have 128 MiB)


def _auto_tiles(S, V, H, out_bytes, vmem_budget):
    def vmem_use(ts, tv):
        return (2 * ts * H * 2            # hidden tile, bf16, double-buffered
                + 2 * H * tv * 2          # lm_head weight tile, bf16, x2
                + 2 * ts * tv * out_bytes  # logits tile, x2
                + ts * H * 2              # fused scratch (single buffer)
                + 2 * H * 2)              # gated kg projection, x2
    # ts is the big lever (each doubling halves the lm_head weight re-stream):
    # maximize ts first, then tv.
    for ts in _divisor_tiles(S, 2048, 16):
        for tv in _divisor_tiles(V, 1024, 128):
            if vmem_use(ts, tv) <= vmem_budget:
                return ts, tv
    return _divisor_tiles(S, 2048, 16)[-1], _divisor_tiles(V, 1024, 128)[-1]


# ----------------------------------------------------------------------------
# Wrapper
# ----------------------------------------------------------------------------
def kg_fused_lm_forward(last_hidden, kg_embedding, params, *, ts=None, tv=None,
                        out_dtype=jnp.bfloat16):
    """logits = lm_head(last_hidden + sigmoid(gate(kg)) * tanh(kg_transform(kg)))."""
    B, S, H = last_hidden.shape

    w_head = params.get("w_head_bf16")
    if w_head is None:
        # TODO(synk): keep the lm_head weight persistently in bf16 — a per-call
        # cast re-reads/writes ~1.5x the weight size of HBM at real Llama scale.
        w_head = params["w_head"].astype(jnp.bfloat16)
    V = w_head.shape[1]

    # --- cheap per-batch KG fusion, hoisted out of the kernel (M=1 matmuls) ---
    kg = kg_embedding.astype(jnp.float32)
    kg_proj = jnp.tanh(kg @ params["w_t"] + params["b_t"])             # (B, H)
    gate = jax.nn.sigmoid(kg @ params["w_g"] + params["b_g"])          # (B, 1)
    gated = (gate * kg_proj).astype(jnp.bfloat16).reshape(B, 1, H)     # (B,1,H)

    hidden_bf16 = last_hidden.astype(jnp.bfloat16)   # no-op for a bf16 backbone

    out_bytes = jnp.dtype(out_dtype).itemsize
    vmem_cap = _vmem_capacity_bytes()
    if ts is None or tv is None:
        a_ts, a_tv = _auto_tiles(S, V, H, out_bytes, int(vmem_cap * 0.70))
        ts = a_ts if ts is None else ts
        tv = a_tv if tv is None else tv
    assert S % ts == 0 and V % tv == 0, "S/V must be divisible by the tile sizes"
    assert ts % 16 == 0 or ts == S        # bf16 sublane packing
    assert tv % 128 == 0 or tv == V       # lane-dense, unmasked stores

    # NOTE(v7x megacore): keep B * (S // ts) >= 2 so both TensorCores get work.
    grid = (B, S // ts, V // tv)

    grid_spec = pltpu.PrefetchScalarGridSpec(
        num_scalar_prefetch=0,
        grid=grid,
        in_specs=[
            pl.BlockSpec((1, 1, H), lambda b, s, j: (b, 0, 0)),    # gated kg proj
            pl.BlockSpec((H, tv), lambda b, s, j: (0, j)),         # lm_head (V tiled)
            pl.BlockSpec((1, ts, H), lambda b, s, j: (b, s, 0)),   # hidden (B,S tiled)
        ],
        out_specs=pl.BlockSpec((1, ts, tv), lambda b, s, j: (b, s, j)),
        scratch_shapes=[pltpu.VMEM((ts, H), jnp.bfloat16)],        # cached fused tile
    )

    s_tiles = S // ts
    flops = 2 * B * S * H * V + B * S * H
    bytes_accessed = (B * S * H * 2                 # hidden in (bf16)
                      + B * s_tiles * H * V * 2     # lm_head re-streamed per (b,s-tile)
                      + B * S * V * out_bytes       # logits out
                      + B * H * 2)                  # gated kg proj in

    return pl.pallas_call(
        _kg_fused_lm_kernel,
        out_shape=jax.ShapeDtypeStruct((B, S, V), out_dtype),
        grid_spec=grid_spec,
        compiler_params=pltpu.CompilerParams(
            dimension_semantics=("parallel", "parallel", "arbitrary"),
            vmem_limit_bytes=int(vmem_cap * 0.85)),
        cost_estimate=pl.CostEstimate(
            flops=flops, transcendentals=0, bytes_accessed=bytes_accessed),
    )(gated, w_head, hidden_bf16)


# ----------------------------------------------------------------------------
# Plain-JAX reference + glue (module semantics, for verification)
# ----------------------------------------------------------------------------
def kg_fused_lm_reference(last_hidden, kg_embedding, params):
    kg_proj = jnp.tanh(kg_embedding @ params["w_t"] + params["b_t"])      # (B, H)
    gate = jax.nn.sigmoid(kg_embedding @ params["w_g"] + params["b_g"])   # (B, 1)
    fused = last_hidden + gate[:, None, :] * kg_proj[:, None, :]          # (B, S, H)
    return fused @ params["w_head"]                                       # (B, S, V)


def cross_entropy_loss(logits, labels):
    """shift_logits vs shift_labels mean cross-entropy (plain-JAX glue)."""
    shift_logits = logits[:, :-1, :]
    shift_labels = labels[:, 1:]
    logp = jax.nn.log_softmax(shift_logits, axis=-1)
    nll = -jnp.take_along_axis(logp, shift_labels[..., None], axis=-1)[..., 0]
    return jnp.mean(nll)


def init_params(key, kg_dim, hidden, vocab):
    k1, k2, k3, k4, k5, k6 = jax.random.split(key, 6)
    s = 0.02
    w_head = s * jax.random.normal(k5, (hidden, vocab), jnp.float32)
    return {
        "w_t": s * jax.random.normal(k1, (kg_dim, hidden), jnp.float32),
        "b_t": s * jax.random.normal(k2, (1, hidden), jnp.float32),
        "w_g": s * jax.random.normal(k3, (kg_dim, 1), jnp.float32),
        "b_g": s * jax.random.normal(k4, (1, 1), jnp.float32),
        "w_head": w_head,                              # f32 copy (reference only)
        "w_head_bf16": w_head.astype(jnp.bfloat16),    # persistent bf16 MXU operand
        "embed": s * jax.random.normal(k6, (vocab, hidden), jnp.float32),
    }


if __name__ == "__main__":
    # Small, hardware-aligned shapes; explicit small tiles so the tiled
    # (b, s-tile, v-tile) path and the per-(b,s)-tile scratch cache are
    # actually exercised:  grid = (2, 2, 2).
    B, S, H, V, Kd = 2, 32, 128, 512, 128
    TS, TV = 16, 256

    key = jax.random.PRNGKey(0)
    kp, ki, kk = jax.random.split(key, 3)
    params = init_params(kp, Kd, H, V)

    input_ids = jax.random.randint(ki, (B, S), 0, V, dtype=jnp.int32)
    labels = input_ids
    kg_embedding = jax.random.normal(kk, (B, Kd), jnp.float32)

    # Stand-in for llama(...).hidden_states[-1] (see TODO above).
    last_hidden = params["embed"][input_ids]            # (B, S, H) f32

    logits = kg_fused_lm_forward(last_hidden, kg_embedding, params, ts=TS, tv=TV)
    logits = jax.block_until_ready(logits)
    assert logits.shape == (B, S, V)

    # Verify the bf16 MXU path against the f32 reference (intentional bf16
    # precision choice for hidden / weight / logits; loose tolerance).
    ref = jax.block_until_ready(kg_fused_lm_reference(last_hidden, kg_embedding, params))
    logits_f32 = logits.astype(jnp.float32)
    assert jnp.allclose(logits_f32, ref, atol=1e-2, rtol=5e-2), (
        float(jnp.max(jnp.abs(logits_f32 - ref))))

    loss = jax.block_until_ready(cross_entropy_loss(logits_f32, labels))
    assert jnp.isfinite(loss)

    print("KERNEL_OK")
</pallas_src>

<mosaic_0001>
module attributes {stable_mosaic.version = 11 : i64} {
  func.func @_kg_fused_lm_kernel(%arg0: i32, %arg1: i32, %arg2: i32, %arg3: memref<1x1x128xbf16, #tpu.memory_space<vmem>>, %arg4: memref<128x256xbf16, #tpu.memory_space<vmem>>, %arg5: memref<1x16x128xbf16, #tpu.memory_space<vmem>>, %arg6: memref<1x16x256xbf16, #tpu.memory_space<vmem>>, %arg7: memref<16x128xbf16, #tpu.memory_space<vmem>>) attributes {dimension_semantics = [#tpu.dimension_semantics<parallel>, #tpu.dimension_semantics<parallel>, #tpu.dimension_semantics<arbitrary>], iteration_bounds = array<i64: 2, 2, 2>, scalar_prefetch = 0 : i64, scratch_operands = 1 : i64, tpu.core_type = #tpu.core_type<tc>, window_params = [{transform_indices = @transform_0, window_bounds = array<i64: 1, 1, 128>}, {transform_indices = @transform_1, window_bounds = array<i64: 128, 256>}, {transform_indices = @transform_2, window_bounds = array<i64: 1, 16, 128>}, {transform_indices = @transform_3, window_bounds = array<i64: 1, 16, 256>}]} {
    %c0_i32 = arith.constant 0 : i32
    %0 = arith.cmpi eq, %arg2, %c0_i32 : i32
    %1 = arith.extui %0 : i1 to i32
    %c0_i32_0 = arith.constant 0 : i32
    %2 = arith.cmpi ne, %1, %c0_i32_0 : i32
    scf.if %2 {
      %c0_7 = arith.constant 0 : index
      %c0_8 = arith.constant 0 : index
      %c0_9 = arith.constant 0 : index
      %10 = vector.load %arg5[%c0_7, %c0_8, %c0_9] : memref<1x16x128xbf16, #tpu.memory_space<vmem>>, vector<1x16x128xbf16>
      %11 = vector.shape_cast %10 : vector<1x16x128xbf16> to vector<16x128xbf16>
      %c0_10 = arith.constant 0 : index
      %c0_11 = arith.constant 0 : index
      %c0_12 = arith.constant 0 : index
      %12 = vector.load %arg3[%c0_10, %c0_11, %c0_12] : memref<1x1x128xbf16, #tpu.memory_space<vmem>>, vector<1x1x128xbf16>
      %13 = vector.shape_cast %12 : vector<1x1x128xbf16> to vector<1x128xbf16>
      %14 = vector.broadcast %13 : vector<1x128xbf16> to vector<16x128xbf16>
      %15 = arith.addf %11, %14 : vector<16x128xbf16>
      %c0_13 = arith.constant 0 : index
      %c0_14 = arith.constant 0 : index
      %16 = vector.load %arg7[%c0_13, %c0_14] : memref<16x128xbf16, #tpu.memory_space<vmem>>, vector<16x128xbf16>
      tpu.vector_store %arg7[%c0_13, %c0_14], %15 {strides = array<i32>} : memref<16x128xbf16, #tpu.memory_space<vmem>>, vector<16x128xbf16>,
    } else {
    }
    %c0 = arith.constant 0 : index
    %c0_1 = arith.constant 0 : index
    %3 = vector.load %arg7[%c0, %c0_1] : memref<16x128xbf16, #tpu.memory_space<vmem>>, vector<16x128xbf16>
    %c0_2 = arith.constant 0 : index
    %c0_3 = arith.constant 0 : index
    %4 = vector.load %arg4[%c0_2, %c0_3] : memref<128x256xbf16, #tpu.memory_space<vmem>>, vector<128x256xbf16>
    %cst = arith.constant dense<0.000000e+00> : vector<16x256xf32>
    %5 = tpu.matmul %3, %4, %cst {dimension_numbers = #tpu.dot_dimension_numbers<[1], [0], [0], [1], [0, 0, 1, 1], [], []>} : vector<16x128xbf16>, vector<128x256xbf16>, vector<16x256xf32> -> vector<16x256xf32>
    %6 = arith.truncf %5 : vector<16x256xf32> to vector<16x256xbf16>
    %c0_4 = arith.constant 0 : index
    %c0_5 = arith.constant 0 : index
    %c0_6 = arith.constant 0 : index
    %7 = vector.load %arg6[%c0_4, %c0_5, %c0_6] : memref<1x16x256xbf16, #tpu.memory_space<vmem>>, vector<1x16x256xbf16>
    %8 = vector.shape_cast %7 : vector<1x16x256xbf16> to vector<16x256xbf16>
    %9 = vector.shape_cast %6 : vector<16x256xbf16> to vector<1x16x256xbf16>
    tpu.vector_store %arg6[%c0_4, %c0_5, %c0_6], %9 {strides = array<i32>} : memref<1x16x256xbf16, #tpu.memory_space<vmem>>, vector<1x16x256xbf16>,
    return
  }
  func.func @transform_0(%arg0: i32, %arg1: i32, %arg2: i32) -> (i32, i32, i32) {
    %c0_i32 = arith.constant 0 : i32
    %c0_i32_0 = arith.constant 0 : i32
    %c0_i32_1 = arith.constant 0 : i32
    return %arg0, %c0_i32, %c0_i32_0 : i32, i32, i32
  }
  func.func @transform_1(%arg0: i32, %arg1: i32, %arg2: i32) -> (i32, i32) {
    %c0_i32 = arith.constant 0 : i32
    %c0_i32_0 = arith.constant 0 : i32
    return %c0_i32, %arg2 : i32, i32
  }
  func.func @transform_2(%arg0: i32, %arg1: i32, %arg2: i32) -> (i32, i32, i32) {
    %c0_i32 = arith.constant 0 : i32
    %c0_i32_0 = arith.constant 0 : i32
    return %arg0, %arg1, %c0_i32 : i32, i32, i32
  }
  func.func @transform_3(%arg0: i32, %arg1: i32, %arg2: i32) -> (i32, i32, i32) {
    %c0_i32 = arith.constant 0 : i32
    return %arg0, %arg1, %arg2 : i32, i32, i32
  }
}

</mosaic_0001>

<bundles_post_ra>
// kernel: tpu_custom_call.1
= control target key start
LH: loop header
LB: loop body
LE: loop exit
PB: predicated region body
PF: predicated region fallthrough
CT: control target
= control target key end

     0   :  { %s1453_s0 = inlined_call_operand.vmem [shape: bf16[2,1,128], index: 0, kind: input, shape index: {}]   ;;  %s1454_s1 = inlined_call_operand.hbm [shape: bf16[128,512], index: 1, kind: input, shape index: {}]   ;;  %s1455_s2 = inlined_call_operand.hbm [shape: bf16[2,32,128], index: 2, kind: input, shape index: {}]   ;;  %s1456_s3 = inlined_call_operand.hbm [shape: bf16[2,32,512], index: 3, kind: output, shape index: {}]  }
   0x1   :  { %1466 = sst [smem:[#allocation23_spill]] %s1453_s0 }
   0x2   :  { %1467 = sst [smem:[#allocation24_spill]] %s1454_s1 }
   0x3   :  { %1468 = sst [smem:[#allocation25_spill]] %s1456_s3 }
   0x4   :  { %8 = vsyncpa [#allocation4], 0 }
   0x5   :  { %10 = vsyncpa [#allocation4 + $0x1], 0 }
   0x6   :  { %11 = vsyncpa [#allocation7], 0 }
   0x7   :  { %13 = vsyncpa [#allocation7 + $0x1], 0 }
   0x8   :  { %14 = vsyncpa [#allocation5], 0 }
   0x9   :  { %16 = vsyncpa [#allocation5 + $0x1], 0  ;;  %s1116_s12 = smov 0   ;;  %s1118_s13 = smov 0  }
   0xa   :  { %s1120_s14 = smov 0   ;;  %s1122_s15 = smov 0  }
   0xb   :  { %s1124_s16 = smov 0   ;;  %s1126_s17 = smov 0  }
   0xc   :  { %s1128_s18 = smov 0   ;;  %s1130_s19 = smov 0  }
   0xd   :  { %s1132_s20 = smov 0   ;;  %s1134_s21 = smov 0  }
   0xe   :  { %s1136_s22 = smov 0   ;;  %s1138_s23 = smov 0  }
   0xf   :  { %s1140_s24 = smov 0   ;;  %s1142_s25 = smov 0  }
  0x10   :  { %s1144_s26 = smov 0   ;;  %s1146_s27 = smov 0  }
  0x11 LB: > { %1469 = sst [smem:[#allocation12_spill]] %s1026_s12  ;;  %s34_s28 = sadd.s32 1, %s1074_s24  ;;  %s1086_s27 = sphi %s1146_s27, %s22_s27   ;;  %s1082_s26 = sphi %s1144_s26, %s1519_s26   ;;  %s1078_s25 = sphi %s1142_s25, %s1518_s25   ;;  %s1074_s24 = sphi %s1140_s24, %s1517_s24   ;;  %s1070_s23 = sphi %s1138_s23, %s1516_s23   ;;  %s1066_s22 = sphi %s1136_s22, %s1515_s22   ;;  %s1062_s21 = sphi %s1134_s21, %s1514_s21   ;;  %s1058_s20 = sphi %s1132_s20, %s1500_s20   ;;  %s1054_s19 = sphi %s1130_s19, %s1513_s19   ;;  %s1050_s18 = sphi %s1128_s18, %s1512_s18   ;;  %s1046_s17 = sphi %s1126_s17, %s1511_s17   ;;  %s1042_s16 = sphi %s1124_s16, %s1510_s16   ;;  %s1038_s15 = sphi %s1122_s15, %s1509_s15   ;;  %s1034_s14 = sphi %s1120_s14, %s1508_s14   ;;  %s1030_s13 = sphi %s1118_s13, %s1507_s13   ;;  %s1026_s12 = sphi %s1116_s12, %s1505_s12  }
  0x12   : > { %1470 = sst [smem:[#allocation13_spill]] %s1058_s20  ;;  %s74_s29 = sadd.s32 1, %s1058_s20 }
  0x13   : > { %1471 = sst [smem:[#allocation14_spill]] %s1062_s21  ;;  %p1198_p0 = scmp.ge.s32.totalorder %s34_s28, 2 }
  0x14   : > { %1472 = sst [smem:[#allocation15_spill]] %s1066_s22  ;;  %p81_p1 = scmp.ne.s32.totalorder %s1058_s20, %s1054_s19 }
  0x15   : > { %1473 = sst [smem:[#allocation16_spill]] %s1074_s24  ;;  %p82_p2 = scmp.eq.s32.totalorder %s1086_s27, 0 }
  0x16   : > { %p87_p3 = scmp.ne.s32.totalorder %s1054_s19, %s1050_s18  ;;  %s1521_s28 = smov (%p1198_p0, %s34_s28), 0 }
  0x17   : > { %1475 = sst [smem:[#allocation17_spill]] %s1521_s28  ;;  %p1213_p4 = por %p82_p2, %p81_p1 }
  0x18   : > { %s1219_s5 = ssub.s32 %s1074_s24, %s1521_s28  ;;  %p722_p5 = scmp.lt.s32.totalorder %s1086_s27, 8 }
  0x19   : > { %p72_p6 = scmp.eq.s32.totalorder %s1219_s5, 0  ;;  %s175_s6 = sand.u32 1, %s1058_s20  }
  0x1a   : > { %s589_s7 = sshll.u32 %s175_s6, 7  ;;  %s677_s9 = sshll.u32 %s1074_s24, 3 }
  0x1b   : > { %s1225_s8 = scalar_select %p72_p6, %s1058_s20, %s74_s29  }
  0x1c   : > { %s1478_s1 = sld [smem:[#allocation24_spill]]  ;;  %s179_s22 = scalar_lea.vmem [#allocation3], %s589_s7 }
  0x1d   : > { %1477 = sst [smem:[#allocation18_spill]] %s1225_s8  ;;  %s187_s28 = sshll.u32 %s179_s22, 4  ;;  %s188_s28 = int_to_ptr.vmem [resolvable:$true] %s187_s28 }
  0x1e   : > { %p712_p7 = pnand %p722_p5, %p1213_p4  ;;  %s176_s29 = scalar_lea.sflag [#allocation4], %s175_s6 }
  0x1f   : > { %s1088_s10 = smov 256   ;;  %s1090_s7 = smov 8  }
  0x20   : > { %p596_p8 = scmp.ge.s32.totalorder %s1086_s27, 1  ;;  %p219_p9 = scmp.lt.s32.totalorder %s1086_s27, 9 }
  0x21   : > { %s585_s22 = sadd.s32 4294967295, %s1086_s27   ;;  %s586_s4 = sadd.s32 4294967294, %s1086_s27  }
  0x22   : > { %s184_s3 = scalar_lea.hbm %s1478_s1, %s677_s9  ;;  %s1089_s9 = smov 128  }
  0x23   : > { %s185_s21 = sshll.u32 %s184_s3, 4  ;;  %p1237_p10 = pnand %p596_p8, %p219_p9  ;;  %s186_s21 = int_to_ptr.hbm [resolvable:$true] %s185_s21 }
  0x24   : > { %714 = dma.hbm_to_vmem [thread:$0]  (!%p712_p7), %s186_s21, 2048, %s188_s28, %s176_s29, %s1088_s10, %s1089_s9, %s1090_s7  }
  0x25   : > { %s37_s6 = sadd.s32 1, %s1078_s25  ;;  %s41_s11 = sadd.s32 1, %s1082_s26 }
  0x26   : > { %s1523_s6 = smov (!%p1198_p0, %s37_s6), %s1078_s25  ;;  %p1248_p11 = scmp.eq.s32.totalorder %s585_s22, 0 }
  0x27   : > { %p39_p12 = scmp.ge.s32.totalorder %s1523_s6, 2  ;;  %s102_s28 = sadd.s32 1, %s1046_s17 }
  0x28   : > { %p1258_p13 = por %p1248_p11, %p87_p3  ;;  %p109_p1 = scmp.ne.s32.totalorder %s1046_s17, %s1042_s16 }
  0x29   : > { %s1525_s6 = smov (%p39_p12, %s1523_s6), 0  ;;  %s1527_s11 = smov (!%p39_p12, %s41_s11), %s1082_s26 }
  0x2a   : > { %1482 = sst [smem:[#allocation19_spill]] %s1525_s6  ;;  %s98_s30 = ssub.s32 %s1078_s25, %s1525_s6 }
  0x2b   : > { %p1271_p0 = por %p109_p1, %p82_p2  ;;  %p43_p4 = scmp.ge.s32.totalorder %s1527_s11, 2 }
  0x2c   : > { %p115_p6 = scmp.ne.s32.totalorder %s1042_s16, %s1038_s15  ;;  %s132_s18 = sadd.s32 1, %s1034_s14 }
  0x2d   : > { %p142_p3 = scmp.ne.s32.totalorder %s1034_s14, %s1030_s13  ;;  %s1529_s11 = smov (%p43_p4, %s1527_s11), 0 }
  0x2e   : > { %1484 = sst [smem:[#allocation20_spill]] %s1529_s11  ;;  %p1284_p7 = por %p115_p6, %p1248_p11 }
  0x2f   : > { %p143_p2 = scmp.eq.s32.totalorder %s585_s22, 7  ;;  %s97_s7 = ssub.s32 %s1082_s26, %s1529_s11 }
  0x30   : > { %p148_p8 = scmp.ne.s32.totalorder %s1030_s13, %s1026_s12  ;;  %s99_s1 = sor.u32 %s98_s30, %s97_s7 }
  0x31   : > { %p1292_p9 = por %p143_p2, %p142_p3  ;;  %p100_p12 = scmp.eq.s32.totalorder %s99_s1, 0 }
  0x32   : > { %s129_s15 = sor.u32 %s99_s1, %s1219_s5  ;;  %p149_p4 = scmp.eq.s32.totalorder %s586_s4, 7 }
  0x33   : > { %s1486_s6 = scalar_select %p1292_p9, 1, 0 }
  0x34   : > { %p130_p1 = scmp.eq.s32.totalorder %s129_s15, 0  ;;  %p1303_p11 = por %p149_p4, %p148_p8 }
  0x35   : > { %1487 = sst [smem:[#allocation21_spill]] %s1486_s6  ;;  %s197_s22 = sand.u32 1, %s1046_s17  }
  0x36   : > { %s1298_s21 = scalar_select %p100_p12, %s1046_s17, %s102_s28  }
  0x37   : > { %s1301_s24 = scalar_select %p130_p1, %s1034_s14, %s132_s18  }
  0x38   : > { %1488 = sst [smem:[#allocation22_spill]] %s1298_s21  ;;  %s592_s30 = sshll.u32 %s197_s22, 3 }
  0x39   : > { %s593_s7 = sshll.u32 %s1078_s25, 1  ;;  %s594_s11 = sshll.u32 %s1082_s26, 2 }
  0x3a   : > { %s201_s20 = scalar_lea.vmem [#allocation6], %s592_s30  ;;  %s206_s6 = sadd.s32 %s594_s11, %s593_s7 }
  0x3b   : > { %s211_s12 = sshll.u32 %s201_s20, 4  ;;  %s595_s0 = sshll.u32 %s206_s6, 2  ;;  %s212_s12 = int_to_ptr.vmem [resolvable:$true] %s211_s12 }
  0x3c   : > { %p715_p6 = pnand %p722_p5, %p1271_p0  ;;  %s208_s4 = scalar_lea.hbm %s1455_s2, %s595_s0 }
  0x3d   : > { %s209_s28 = sshll.u32 %s208_s4, 4  ;;  %s198_s18 = scalar_lea.sflag [#allocation7], %s197_s22  ;;  %s210_s28 = int_to_ptr.hbm [resolvable:$true] %s209_s28 }
  0x3e   : > { %s1091_s15 = smov 64   ;;  %s1092_s21 = smov 4  }
  0x3f   : > { %717 = dma.hbm_to_vmem [thread:$0]  (!%p715_p6), %s210_s28, 128, %s212_s12, %s198_s18, %s1091_s15, %s1091_s15, %s1092_s21  }
  0x40   : > { %223 = sbr.rel (%p1237_p10) target bundleno = 278 (0x116), region = 32  ;;  %s225_s20 = sand.u32 (!%p1237_p10), 1, %s1054_s19  }
  0x41   : > { %s597_s6 = sshll.u32 (!%p1237_p10), %s225_s20, 7  ;;  %s226_s11 = scalar_lea.sflag (!%p1237_p10), [#allocation4], %s225_s20 }
  0x42   : > { %s1320_s10 = scalar_lea.vmem (!%p1237_p10), [#allocation3], %s597_s6 }
  0x45   : > { %1013 = dma.done.wait (%p1258_p13), %s226_s11, 2048  }
  0x46   : > { %1015 = vsyncadd (%p1258_p13), %s226_s11, 4294965248  ;;  %s235_s0 = sand.u32 1, %s1042_s16  }
  0x47   : > { %s598_s22 = sshll.u32 %s235_s0, 3  ;;  %s236_s12 = scalar_lea.sflag [#allocation7], %s235_s0 }
  0x48   : > { %s239_s21 = scalar_lea.vmem [#allocation6], %s598_s22 }
  0x49   : > { %1017 = dma.done.wait (%p1284_p7), %s236_s12, 128  }
  0x4a   : > { %1019 = vsyncadd (%p1284_p7), %s236_s12, 4294967168  ;;  %s268_s3 = sand.u32 1, %s1030_s13   ;;  %p271_p5 = scmp.lt.s32.totalorder %s1070_s23, 1 }
  0x4b   : > { %s599_s29 = sshll.u32 %s268_s3, 4  ;;  %s1490_s5 = sld [smem:[#allocation23_spill]] }
  0x4c   : > { %s272_s30 = scalar_select %p271_p5, %s1070_s23, 1 }
  0x4d   : > { %s1339_s28 = scalar_lea.vmem [#allocation8], %s599_s29  ;;  %s1491_s18 = sld [smem:[#allocation14_spill]] }
  0x51   : > { %s273_s4 = scalar_lea.vmem %s1490_s5, %s272_s30 }
  0x53   : > { %p600_p10 = scmp.ne.s32.totalorder %s1491_s18, 0 }
  0x55   : > { %281 = sbr.rel (%p600_p10) target bundleno = 102 (0x66), region = 44 }
  0x5a   : > { %v697_v0 = vld [vmem:[%s239_s21] sm:$0xff]   ;;  %v284_v1 = vld [vmem:[%s273_s4] sm:$0x1] }
  0x5b   : > { %v286_v2 = vpack.i.b16 %v284_v1, %v284_v1  ;;  %v698_v3 = vunpack.c.l.bf16 %v697_v0  ;;  %v699_v4 = vunpack.c.h.bf16 %v697_v0 }
  0x5d   : > { %v288_v5 = vperm.slane %v286_v2, 0 }
  0x5f   : > { %v291_v6 = vunpack.c.l.bf16 %v288_v5 }
  0x61   : > { %v292_v7 = vadd.f32 %v698_v3, %v291_v6  ;;  %v293_v8 = vadd.f32 %v699_v4, %v291_v6 }
  0x63   : > { %v703_v9 = vpack.c.bf16 %v293_v8, %v292_v7 }
  0x65   : > { %704 = vst [vmem:[#allocation2] sm:$0xff] %v703_v9  }
  0x66 PF: > { %v663_v10 = vld [vmem:[%s1320_s10 + $0x70] sm:$0xf]  ;;  %v694_v11 = vld [vmem:[%s1320_s10 + $0x74] sm:$0xf0]  ;;  %v693_v12 = vld [vmem:[%s1320_s10 + $0x74] sm:$0xf] }
  0x67   : > { %v664_v13 = vor.u32 %v694_v11, %v663_v10  ;;  %v665_v14 = vld [vmem:[%s1320_s10 + $0x78] sm:$0xf0]  ;;  %v655_v15 = vld [vmem:[%s1320_s10 + $0x60] sm:$0xf]  ;;  %v692_v16 = vld [vmem:[%s1320_s10 + $0x64] sm:$0xf0] }
  0x68   : > { %v668_v17 = vor.u32 %v693_v12, %v665_v14  ;;  %v691_v18 = vld [vmem:[%s1320_s10 + $0x64] sm:$0xf]  ;;  %v657_v19 = vld [vmem:[%s1320_s10 + $0x68] sm:$0xf0]  ;;  %v656_v20 = vor.u32 %v692_v16, %v655_v15  ;;  %v647_v22 = vld [vmem:[%s1320_s10 + $0x50] sm:$0xf] }
  0x69   : > { %402 = vmatpush.bf16.msra.mxu0 %v664_v13  ;;  %v660_v21 = vor.u32 %v691_v18, %v657_v19  ;;  %v690_v23 = vld [vmem:[%s1320_s10 + $0x54] sm:$0xf0]  ;;  %v689_v24 = vld [vmem:[%s1320_s10 + $0x54] sm:$0xf]  ;;  %v649_v25 = vld [vmem:[%s1320_s10 + $0x58] sm:$0xf0] }
  0x6a   : > { %416 = vmatpush.bf16.msra.mxu1 %v668_v17  ;;  %v648_v26 = vor.u32 %v690_v23, %v647_v22  ;;  %v652_v27 = vor.u32 %v689_v24, %v649_v25  ;;  %v639_v28 = vld [vmem:[%s1320_s10 + $0x40] sm:$0xf]  ;;  %v688_v29 = vld [vmem:[%s1320_s10 + $0x44] sm:$0xf0]  ;;  %v687_v30 = vld [vmem:[%s1320_s10 + $0x44] sm:$0xf] }
  0x6b   : > { %v641_v31 = vld [vmem:[%s1320_s10 + $0x48] sm:$0xf0]  ;;  %v640_v32 = vor.u32 %v688_v29, %v639_v28  ;;  %v631_v34 = vld [vmem:[%s1320_s10 + $0x30] sm:$0xf]  ;;  %v686_v35 = vld [vmem:[%s1320_s10 + $0x34] sm:$0xf0] }
  0x6c   : > { %v644_v33 = vor.u32 %v687_v30, %v641_v31  ;;  %v685_v36 = vld [vmem:[%s1320_s10 + $0x34] sm:$0xf]  ;;  %v633_v37 = vld [vmem:[%s1320_s10 + $0x38] sm:$0xf0]  ;;  %v632_v38 = vor.u32 %v686_v35, %v631_v34  ;;  %v623_v40 = vld [vmem:[%s1320_s10 + $0x20] sm:$0xf] }
  0x6d   : > { %403 = vmatpush.bf16.msra.mxu0 %v656_v20  ;;  %v636_v39 = vor.u32 %v685_v36, %v633_v37  ;;  %v684_v41 = vld [vmem:[%s1320_s10 + $0x24] sm:$0xf0]  ;;  %v683_v42 = vld [vmem:[%s1320_s10 + $0x24] sm:$0xf]  ;;  %v625_v43 = vld [vmem:[%s1320_s10 + $0x28] sm:$0xf0] }
  0x6e   : > { %417 = vmatpush.bf16.msra.mxu1 %v660_v21  ;;  %v624_v44 = vor.u32 %v684_v41, %v623_v40  ;;  %v628_v45 = vor.u32 %v683_v42, %v625_v43  ;;  %v615_v46 = vld [vmem:[%s1320_s10 + $0x10] sm:$0xf]  ;;  %v682_v47 = vld [vmem:[%s1320_s10 + $0x14] sm:$0xf0]  ;;  %v681_v48 = vld [vmem:[%s1320_s10 + $0x14] sm:$0xf] }
  0x6f   : > { %v617_v49 = vld [vmem:[%s1320_s10 + $0x18] sm:$0xf0]  ;;  %v616_v50 = vor.u32 %v682_v47, %v615_v46  ;;  %s1492_s9 = sld [smem:[#allocation14_spill]]  ;;  %v607_v52 = vld [vmem:[%s1320_s10] sm:$0xf]  ;;  %s673_s0 = sshll.u32 %s1070_s23, 4 }
  0x70   : > { %s1493_s15 = sld [smem:[#allocation15_spill]]  ;;  %v620_v51 = vor.u32 %v681_v48, %v617_v49  ;;  %v680_v53 = vld [vmem:[%s1320_s10 + $0x4] sm:$0xf0]  ;;  %v679_v54 = vld [vmem:[%s1320_s10 + $0x4] sm:$0xf]  ;;  %v678_v58 = vld [vmem:[#allocation2] sm:$0xff] }
  0x71   : > { %404 = vmatpush.bf16.msra.mxu0 %v648_v26  ;;  %v609_v55 = vld [vmem:[%s1320_s10 + $0x8] sm:$0xf0]  ;;  %v608_v56 = vor.u32 %v680_v53, %v607_v52  ;;  %s1494_s29 = sld [smem:[#allocation25_spill]]  ;;  %s452_s1 = sshll.u32 %s1339_s28, 4  ;;  %s453_s1 = int_to_ptr.vmem [resolvable:$true] %s452_s1 }
  0x72   : > { %418 = vmatpush.bf16.msra.mxu1 %v652_v27  ;;  %v612_v57 = vor.u32 %v679_v54, %v609_v55  ;;  %s435_s23 = scalar_lea.sflag [#allocation5], %s268_s3 }
  0x75   : > { %405 = vmatpush.bf16.msra.mxu0 %v640_v32  ;;  %s671_s20 = sshll.u32 %s1492_s9, 1 }
  0x76   : > { %419 = vmatpush.bf16.msra.mxu1 %v644_v33  ;;  %s695_s6 = sshll.u32 %s1493_s15, 3 }
  0x77   : > { %s447_s11 = sadd.s32 %s695_s6, %s671_s20  ;;  %s940_s20 = scalar_lea.hbm %s1494_s29, 128 }
  0x78   : > { %s449_s22 = sadd.s32 %s673_s0, %s447_s11 }
  0x79   : > { %406 = vmatpush.bf16.msra.mxu0 %v632_v38  ;;  %s674_s10 = sshll.u32 %s449_s22, 2 }
  0x7a   : > { %420 = vmatpush.bf16.msra.mxu1 %v636_v39  ;;  %s451_s7 = scalar_lea.hbm %s1494_s29, %s674_s10 }
  0x7b   : > { %s454_s5 = sshll.u32 %s451_s7, 4  ;;  %s455_s5 = int_to_ptr.hbm [resolvable:$true] %s454_s5 }
  0x7c   : > { %s934_s4 = sshra.s32 %s455_s5, 4  ;;  %s935_s4 = int_to_ptr.hbm [resolvable:$true] %s934_s4 }
  0x7d   : > { %407 = vmatpush.bf16.msra.mxu0 %v624_v44  ;;  %s936_s18 = scalar_lea.hbm %s935_s4, 16  ;;  %p941_p7 = scmp.lt.s32.totalorder %s935_s4, %s1494_s29 }
  0x7e   : > { %421 = vmatpush.bf16.msra.mxu1 %v628_v45  ;;  %p937_p13 = scmp.ne.s32.totalorder %s935_s4, %s936_s18  ;;  %p942_p2 = scmp.lt.s32.totalorder %s940_s20, %s936_s18 }
  0x80   : > { %p938_p0 = pnand %p937_p13, %p1292_p9  ;;  %p943_p8 = por %p942_p2, %p941_p7 }
  0x81   : > { %408 = vmatpush.bf16.msra.mxu0 %v616_v50 }
  0x82   : > { %422 = vmatpush.bf16.msra.mxu1 %v620_v51  ;;  %p939_p3 = pneg %p938_p0 }
  0x84   : > { %p944_p12 = pnand %p943_p8, %p939_p3 }
  0x85   : > { %409 = vmatpush.bf16.msra.mxu0 %v608_v56 }
  0x86   : > { %423 = vmatpush.bf16.msra.mxu1 %v612_v57 }
  0x88   : > { %410 = vmatmul.bf16.vlgmr.msra.gmra.mxu0 %v678_v58 }
  0x89   : > { %424 = vmatmul.bf16.vlgmr.msra.gmra.mxu1 %v678_v58 }
 0x105   : > { %v411_v59 = vpop.f32.mrf.mxu0 }
 0x106   : > { %v425_v60 = vpop.f32.mrf.mxu1 }
 0x107   : > { %v430_v61 = vpack.c.bf16 %v425_v60, %v411_v59 }
 0x109   : > { %432 = vst [vmem:[%s1339_s28] sm:$0xff] %v430_v61 }
 0x10d   : > { %v413_v62 = vpop.f32.mrf.mxu0 }
 0x10e   : > { %v427_v63 = vpop.f32.mrf.mxu1 }
 0x10f   : > { %v431_v0 = vpack.c.bf16 %v427_v63, %v413_v62 }
 0x111   : > { %433 = vst [vmem:[%s1339_s28 + $0x8] sm:$0xff] %v431_v0 }
 0x112   : > { %947 = shalt.err (!%p944_p12)
}
 0x113   : > { %s1093_s3 = smov 128   ;;  %s1094_s28 = smov 256  }
 0x114   : > { %s1095_s0 = smov 8  }
 0x115   : > { %709 = dma.vmem_to_hbm [thread:$0]  (%p1292_p9), %s453_s1, 256, %s455_s5, %s435_s23, %s1093_s3, %s1094_s28, %s1095_s0  }
 0x116 PF: > { %s1496_s22 = sld [smem:[#allocation12_spill]]  ;;  %p723_p1 = scmp.ge.s32.totalorder %s1086_s27, 2 }
 0x118   : > { %p719_p4 = pnand %p723_p1, %p1303_p11 }
 0x11a   : > { %p720_p6 = pneg %p719_p4 }
 0x11c   : > { %s469_s10 = sand.u32 1, %s1496_s22  }
 0x11d   : > { %s470_s12 = scalar_lea.sflag [#allocation5], %s469_s10 }
 0x11e   : > { %1021 = dma.done.wait (%p720_p6), %s470_s12, 256  }
 0x11f   : > { %1023 = vsyncadd (%p720_p6), %s470_s12, 4294967040  ;;  %s22_s27 = sadd.s32 1, %s1086_s27   ;;  %s1498_s30 = sld [smem:[#allocation22_spill]] }
 0x120   : > { %p1400_p5 = scmp.ge.s32.totalorder %s22_s27, 10   ;;  %s1499_s7 = sld [smem:[#allocation13_spill]] }
 0x121   : > { %s1500_s20 = sld [smem:[#allocation18_spill]]  ;;  %s1505_s12 = smov %s1030_s13 }
 0x122   : > { %s1501_s8 = sld [smem:[#allocation16_spill]]  ;;  %s1507_s13 = smov %s1034_s14 }
 0x123   : > { %s1502_s1 = sld [smem:[#allocation17_spill]]  ;;  %s1508_s14 = smov %s1301_s24 }
 0x124   : > { %s1503_s5 = sld [smem:[#allocation19_spill]]  ;;  %s1509_s15 = smov %s1042_s16 }
 0x125   : > { %s1504_s4 = sld [smem:[#allocation20_spill]]  ;;  %s1510_s16 = smov %s1046_s17 }
 0x126   : > { %s1511_s17 = smov %s1498_s30  ;;  %s1512_s18 = smov %s1054_s19 }
 0x127   : > { %s1513_s19 = smov %s1499_s7  ;;  %s1515_s22 = smov %s1078_s25 }
 0x128   : > { %s1514_s21 = smov %s1501_s8  ;;  %s1516_s23 = smov %s1082_s26 }
 0x129   : > { %s1517_s24 = smov %s1502_s1  ;;  %21 = sbr.rel (!%p1400_p5) target bundleno = 17 (0x11), region = 97 }
 0x12a   : > { %s1518_s25 = smov %s1503_s5 }
 0x12b   : > { %s1519_s26 = smov %s1504_s4 }
 0x12e   :  { %476 = vsyncpa [#allocation4], 1 }
 0x12f   :  { %478 = vsyncpa [#allocation4 + $0x1], 1 }
 0x130   :  { %479 = vsyncpa [#allocation7], 1 }
 0x131   :  { %481 = vsyncpa [#allocation7 + $0x1], 1 }
 0x132   :  { %482 = vsyncpa [#allocation5], 1 }
 0x133   :  { %484 = vsyncpa [#allocation5 + $0x1], 1 }

</bundles_post_ra>
